<compile_context>
chip_gen: v5e
topology: v5e:2x2
jax: 0.10.0
libtpu: 0.0.40
codegen_flags: <defaults>
</compile_context>

<pallas_src>
import functools
import math

import jax
import jax.numpy as jnp
from jax.experimental import pallas as pl
from jax.experimental.pallas import tpu as pltpu

_LANE = 128                       # single-head output padded to a multiple of this
_HALF = 64                        # dual-head per-head pad unit (2*_HALF = 128 lanes)
_DEFAULT_TILE_B = 2048            # grid-free threshold / default batch tile
_VMEM_LIMIT = 32 * 1024 * 1024    # > v5e's 16 MiB scoped default; fine on v6e/v7x


def _round_up(n, m):
    return (n + m - 1) // m * m


# ---------------------------------------------------------------------------
# Kernel bodies
# ---------------------------------------------------------------------------
def _single_head_kernel(x_ref, w_ref, b_ref, o_ref, *, is_actor):
    # obs is cast to the weight dtype in-kernel (bf16 path) -> no pre-kernel op.
    x = x_ref[...].astype(w_ref.dtype)
    acc = jnp.dot(x, w_ref[...], preferred_element_type=jnp.float32)  # MXU
    act = jnp.maximum(acc + b_ref[...], 0.0)                          # f32 VPU
    if is_actor:
        act = jnp.tanh(act)                                           # EUP
    o_ref[...] = act.astype(o_ref.dtype)


_KERNEL_ACTOR = functools.partial(_single_head_kernel, is_actor=True)
_KERNEL_CRITIC = functools.partial(_single_head_kernel, is_actor=False)


def _dual_packed_kernel(x_ref, w_ref, b_ref, o_ref):
    """Shared-trunk actor+critic packed into ONE 128-multiple output slab.

    w_ref/b_ref hold the weight duplicated along lanes: [W|0pad | W|0pad] with
    per-head width half (multiple of 64).  One matmul produces both copies;
    lanes < half keep ReLU (critic), lanes >= half get tanh(ReLU) (actor).
    Padded lanes stay exactly 0: padded bias is 0 -> relu = 0 -> tanh(0) = 0.
    """
    x = x_ref[...].astype(w_ref.dtype)
    acc = jnp.dot(x, w_ref[...], preferred_element_type=jnp.float32)  # MXU
    relu = jnp.maximum(acc + b_ref[...], 0.0)                         # (rows, 2*half)
    half = relu.shape[-1] // 2
    lane = jax.lax.broadcasted_iota(jnp.int32, relu.shape, dimension=1)
    o_ref[...] = jnp.where(lane < half, relu, jnp.tanh(relu)).astype(o_ref.dtype)


# ---------------------------------------------------------------------------
# Launch helper
# ---------------------------------------------------------------------------
def _launch(kernel, obs, w_p, b_p, out_width, tile_b):
    B, in_dim = obs.shape
    out_shape = jax.ShapeDtypeStruct((B, out_width), jnp.float32)

    if B <= tile_b:
        # Single VMEM-resident block: no grid, no pipeline prologue/epilogue.
        return pl.pallas_call(kernel, out_shape=out_shape)(obs, w_p, b_p)

    # Tiled batch: ragged B handled by Pallas' masked partial last block
    # (no jnp.pad of obs).  Weights/bias stay resident via constant index_maps.
    grid = (pl.cdiv(B, tile_b),)
    return pl.pallas_call(
        kernel,
        out_shape=out_shape,
        grid=grid,
        in_specs=[
            pl.BlockSpec((tile_b, in_dim), lambda i: (i, 0)),          # obs tiles
            pl.BlockSpec((in_dim, w_p.shape[1]), lambda i: (0, 0)),    # W resident
            pl.BlockSpec((1, w_p.shape[1]), lambda i: (0, 0)),         # b resident
        ],
        out_specs=pl.BlockSpec((tile_b, out_width), lambda i: (i, 0)),
        compiler_params=pltpu.CompilerParams(
            dimension_semantics=("parallel",),   # shard batch across v7x's 2 TCs
            vmem_limit_bytes=_VMEM_LIMIT,
        ),
    )(obs, w_p, b_p)


# ---------------------------------------------------------------------------
# Parameter preparation (one-time, hoisted out of the forward path)
# ---------------------------------------------------------------------------
def prepare_params(w_t, b, *, use_bf16=False):
    """Build lane-dense layouts once.  Returns (w_single, b_single, w_dual, b_dual).

    w_single: (in_dim, round_up(out_dim,128)), zero-padded, for single-head calls.
    w_dual  : (in_dim, 2*half), half = round_up(out_dim, 64), weight duplicated
              [W | W] so one matmul feeds both packed heads.
    Biases stay float32; padding is ZERO (required so padded lanes remain 0
    through relu/tanh before the wrapper slice).
    use_bf16 casts the matmul weights to bf16 on ANY chip (v5e/v6e/v7x MXUs are
    bf16-native); accumulation stays f32 via preferred_element_type.
    """
    in_dim, out_dim = w_t.shape
    w_t = w_t.astype(jnp.float32)
    b = b.astype(jnp.float32).reshape(1, out_dim)

    out_p = _round_up(out_dim, _LANE)
    w_single = jnp.pad(w_t, ((0, 0), (0, out_p - out_dim)))
    b_single = jnp.pad(b, ((0, 0), (0, out_p - out_dim)))

    half = _round_up(out_dim, _HALF)
    w_half = jnp.pad(w_t, ((0, 0), (0, half - out_dim)))
    b_half = jnp.pad(b, ((0, 0), (0, half - out_dim)))
    w_dual = jnp.concatenate([w_half, w_half], axis=1)
    b_dual = jnp.concatenate([b_half, b_half], axis=1)

    mm_dtype = jnp.bfloat16 if use_bf16 else jnp.float32
    return (w_single.astype(mm_dtype), b_single,
            w_dual.astype(mm_dtype), b_dual)


# ---------------------------------------------------------------------------
# Jitted forwards
# ---------------------------------------------------------------------------
@functools.partial(jax.jit, static_argnames=("out_dim", "is_actor", "tile_b"))
def feed_forward_nn(obs, w_p, b_p, *, out_dim, is_actor, tile_b=_DEFAULT_TILE_B):
    """Module-faithful forward: relu(obs @ W.T + b), then tanh if is_actor."""
    squeeze = obs.ndim == 1
    if squeeze:
        obs = obs[None, :]
    kernel = _KERNEL_ACTOR if is_actor else _KERNEL_CRITIC
    out = _launch(kernel, obs, w_p, b_p, w_p.shape[1], tile_b)
    out = out[:, :out_dim]               # fuses with consumers under jit
    return out[0] if squeeze else out


@functools.partial(jax.jit,
                   static_argnames=("out_dim", "tile_b", "return_packed"))
def feed_forward_nn_dual(obs, w_dual, b_dual, *, out_dim,
                         tile_b=_DEFAULT_TILE_B, return_packed=False):
    """Fused actor+critic sharing one Linear: one matmul, one packed output.

    Returns (critic, actor).  With return_packed=True, returns the raw
    (B, 2*half) slab (critic = [:, :out_dim], actor = [:, half:half+out_dim])
    so consumers can slice lazily and the split never touches HBM.
    """
    squeeze = obs.ndim == 1
    if squeeze:
        obs = obs[None, :]
    packed_w = w_dual.shape[1]
    half = packed_w // 2
    packed = _launch(_dual_packed_kernel, obs, w_dual, b_dual, packed_w, tile_b)
    if return_packed:
        return packed[0] if squeeze else packed
    critic = packed[:, :out_dim]
    actor = packed[:, half:half + out_dim]
    if squeeze:
        critic, actor = critic[0], actor[0]
    return critic, actor


def init_linear_params(key, in_dim, out_dim):
    """Deterministic init matching nn.Linear's U(-1/sqrt(in_dim), 1/sqrt(in_dim))."""
    kw, kb = jax.random.split(key)
    bound = 1.0 / math.sqrt(in_dim)
    # PyTorch stores weight as (out_dim, in_dim); we keep the transpose.
    w_t = jax.random.uniform(kw, (in_dim, out_dim), jnp.float32, -bound, bound)
    b = jax.random.uniform(kb, (out_dim,), jnp.float32, -bound, bound)
    return w_t, b


# TODO(synk): the torch module's np.ndarray/np.float -> tensor coercion is
# host-side input handling and has no kernel equivalent; callers pass jnp arrays.

if __name__ == "__main__":
    key = jax.random.PRNGKey(0)
    k_obs, k_params, k_big, k_rag = jax.random.split(key, 4)

    in_dim, out_dim = 16, 32
    w_t, b = init_linear_params(k_params, in_dim, out_dim)

    # One-time layout prep (hoisted out of the forward path).
    w_s, b_s, w_d, b_d = prepare_params(w_t, b)                     # f32 matmul
    w_s16, b_s16, w_d16, b_d16 = prepare_params(w_t, b, use_bf16=True)  # bf16 matmul

    # --- small, module-faithful single-head calls (B=8, grid-free path) -----
    obs = jax.random.normal(k_obs, (8, in_dim), jnp.float32)
    out_actor = feed_forward_nn(obs, w_s, b_s, out_dim=out_dim, is_actor=True)
    out_critic = feed_forward_nn(obs, w_s, b_s, out_dim=out_dim, is_actor=False)

    # --- fused dual head, packed single output (grid-free path) -------------
    critic_f, actor_f = feed_forward_nn_dual(obs, w_d, b_d, out_dim=out_dim)

    # --- large batch: tiled path, >=2 grid steps (v7x megacore) -------------
    obs_big = jax.random.normal(k_big, (4096, in_dim), jnp.float32)
    critic_big, actor_big = feed_forward_nn_dual(
        obs_big, w_d, b_d, out_dim=out_dim, tile_b=1024)

    # --- ragged batch: partial last block, no jnp.pad of obs ----------------
    obs_rag = jax.random.normal(k_rag, (1000, in_dim), jnp.float32)
    critic_rag, actor_rag = feed_forward_nn_dual(
        obs_rag, w_d, b_d, out_dim=out_dim, tile_b=256)

    # --- bf16 matmul inputs (all chips), f32 accumulation/activations -------
    critic_bf16, actor_bf16 = feed_forward_nn_dual(
        obs_big, w_d16, b_d16, out_dim=out_dim, tile_b=1024)

    jax.block_until_ready((out_actor, out_critic, critic_f, actor_f,
                           critic_big, actor_big, critic_rag, actor_rag,
                           critic_bf16, actor_bf16))

    # --- plain-JAX references ------------------------------------------------
    def ref(o):
        r = jnp.maximum(o @ w_t + b, 0.0)
        return r, jnp.tanh(r)

    r_c, r_a = ref(obs)
    rb_c, rb_a = ref(obs_big)
    rr_c, rr_a = ref(obs_rag)

    assert out_critic.shape == (8, out_dim) and out_actor.shape == (8, out_dim)
    assert jnp.allclose(out_critic, r_c, atol=1e-5, rtol=1e-5)
    assert jnp.allclose(out_actor, r_a, atol=1e-5, rtol=1e-5)
    assert jnp.allclose(critic_f, r_c, atol=1e-5, rtol=1e-5)
    assert jnp.allclose(actor_f, r_a, atol=1e-5, rtol=1e-5)
    assert jnp.allclose(critic_big, rb_c, atol=1e-5, rtol=1e-5)
    assert jnp.allclose(actor_big, rb_a, atol=1e-5, rtol=1e-5)
    assert jnp.allclose(critic_rag, rr_c, atol=1e-5, rtol=1e-5)
    assert jnp.allclose(actor_rag, rr_a, atol=1e-5, rtol=1e-5)
    assert jnp.allclose(critic_bf16, rb_c, atol=5e-2, rtol=5e-2)
    assert jnp.allclose(actor_bf16, rb_a, atol=5e-2, rtol=5e-2)

    print("KERNEL_OK")
</pallas_src>

<mosaic_0001>
module attributes {stable_mosaic.version = 11 : i64} {
  func.func @_single_head_kernel(%arg0: memref<8x16xf32, #tpu.memory_space<vmem>>, %arg1: memref<16x128xf32, #tpu.memory_space<vmem>>, %arg2: memref<1x128xf32, #tpu.memory_space<vmem>>, %arg3: memref<8x128xf32, #tpu.memory_space<vmem>>) attributes {dimension_semantics = [], scalar_prefetch = 0 : i64, scratch_operands = 0 : i64, tpu.core_type = #tpu.core_type<tc>} {
    %c0 = arith.constant 0 : index
    %c0_0 = arith.constant 0 : index
    %0 = vector.load %arg0[%c0, %c0_0] : memref<8x16xf32, #tpu.memory_space<vmem>>, vector<8x16xf32>
    %c0_1 = arith.constant 0 : index
    %c0_2 = arith.constant 0 : index
    %1 = vector.load %arg1[%c0_1, %c0_2] : memref<16x128xf32, #tpu.memory_space<vmem>>, vector<16x128xf32>
    %cst = arith.constant dense<0.000000e+00> : vector<8x128xf32>
    %2 = tpu.matmul %0, %1, %cst {dimension_numbers = #tpu.dot_dimension_numbers<[1], [0], [0], [1], [0, 0, 1, 1], [], []>} : vector<8x16xf32>, vector<16x128xf32>, vector<8x128xf32> -> vector<8x128xf32>
    %c0_3 = arith.constant 0 : index
    %c0_4 = arith.constant 0 : index
    %3 = vector.load %arg2[%c0_3, %c0_4] : memref<1x128xf32, #tpu.memory_space<vmem>>, vector<1x128xf32>
    %4 = vector.broadcast %3 : vector<1x128xf32> to vector<8x128xf32>
    %5 = arith.addf %2, %4 : vector<8x128xf32>
    %cst_5 = arith.constant 0.000000e+00 : f32
    %6 = vector.broadcast %cst_5 : f32 to vector<8x128xf32>
    %7 = arith.maximumf %5, %6 : vector<8x128xf32>
    %8 = math.tanh %7 : vector<8x128xf32>
    %c0_6 = arith.constant 0 : index
    %c0_7 = arith.constant 0 : index
    %9 = vector.load %arg3[%c0_6, %c0_7] : memref<8x128xf32, #tpu.memory_space<vmem>>, vector<8x128xf32>
    tpu.vector_store %arg3[%c0_6, %c0_7], %8 {strides = array<i32>} : memref<8x128xf32, #tpu.memory_space<vmem>>, vector<8x128xf32>,
    return
  }
}

</mosaic_0001>

<bundles_post_ra>
// kernel: feed_forward_nn.1
= control target key start
LH: loop header
LB: loop body
LE: loop exit
PB: predicated region body
PF: predicated region fallthrough
CT: control target
= control target key end

     0   :  { %8 = vsyncpa [#allocation3], 0  ;;  %s221_s0 = inlined_call_operand.hbm [shape: f32[8,16], index: 0, kind: input, shape index: {}]   ;;  %s222_s1 = inlined_call_operand.hbm [shape: f32[16,128], index: 1, kind: input, shape index: {}]   ;;  %s223_s2 = inlined_call_operand.vmem [shape: f32[1,128], index: 2, kind: input, shape index: {}]   ;;  %s224_s3 = inlined_call_operand.hbm [shape: f32[8,128], index: 3, kind: output, shape index: {}]  }
   0x1   :  { %9 = vsyncpa [#allocation6], 0 }
   0x2   :  { %10 = vsyncpa [#allocation4], 0  ;;  %s16_s14 = sshll.u32 %s221_s0, 4  ;;  %s184_s15 = smov [#allocation2]   ;;  %s17_s14 = int_to_ptr.hbm [resolvable:$true] %s16_s14 }
   0x3   :  { %s18_s16 = sshll.u32 %s184_s15, 4  ;;  %s26_s19 = sshll.u32 %s222_s1, 4  ;;  %s19_s16 = int_to_ptr.vmem [resolvable:$true] %s18_s16  ;;  %s27_s19 = int_to_ptr.hbm [resolvable:$true] %s26_s19 }
   0x4   :  { %21 = dma.hbm_to_vmem [thread:$0]  %s17_s14, 128, %s19_s16, [#allocation3]  }
   0x5   :  { %s185_s20 = smov [#allocation5]   ;;  %s186_s22 = smov 128  }
   0x6   :  { %s28_s21 = sshll.u32 %s185_s20, 4  ;;  %s187_s23 = smov 8   ;;  %s29_s21 = int_to_ptr.vmem [resolvable:$true] %s28_s21 }
   0x7   :  { %34 = dma.hbm_to_vmem [thread:$0]  %s27_s19, 256, %s29_s21, [#allocation6], %s186_s22, %s186_s22, %s187_s23  }
   0x8   :  { %178 = dma.done.wait [#allocation3], 128  }
   0x9   :  { %179 = vsyncadd [#allocation3], 4294967168 }
   0xa   :  { %180 = dma.done.wait [#allocation6], 256  }
   0xb   :  { %181 = vsyncadd [#allocation6], 4294967040  ;;  %v47_v0 = vld [vmem:[#allocation5 + $0x8] sm:$0xff]  ;;  %v46_v1 = vld [vmem:[#allocation5] sm:$0xff]  ;;  %vm52_vm0 = vcmask 130048   ;;  %s188_s24 = smov [#allocation7]  }
   0xc   :  { %70 = vmatpush.msra.mxu0 %v47_v0  ;;  %v45_v2 = vld [vmem:[#allocation2] sm:$0xff]  ;;  %s84_s25 = sshll.u32 %s188_s24, 4  ;;  %s86_s28 = sshll.u32 %s224_s3, 4  ;;  %s85_s25 = int_to_ptr.vmem [resolvable:$true] %s84_s25  ;;  %s87_s28 = int_to_ptr.hbm [resolvable:$true] %s86_s28 }
   0xd   :  { %v103_v3 = vld [vmem:[%s223_s2] ss:$0 sm:$0xff] }
   0xe   :  { %71 = vmatpush.msra.mxu0 %v46_v1 }
   0xf   :  { %97 = vmatmul.msk.f32.vlgmr.msra.gmra.mxu0 %vm52_vm0, %v45_v2 }
  0x8c   :  { %v73_v4 = vpop.f32.mrf.mxu0 }
  0x8d   :  { %v74_v5 = vadd.f32 %v103_v3, %v73_v4 }
  0x8f   :  { %v76_v6 = vmax.f32 %v74_v5, 0.0 }
  0x91   :  { %104 = vtanh.f32 %v76_v6 }
  0x97   :  { %v105_v7 = vpop.eup %104 }
  0x98   :  { %78 = vst [vmem:[#allocation7] sm:$0xff] %v105_v7 }
  0x99   :  { %89 = dma.vmem_to_hbm [thread:$0]  %s85_s25, 128, %s87_s28, [#allocation4]  }
  0x9a   :  { %182 = dma.done.wait [#allocation4], 128  }
  0x9b   :  { %183 = vsyncadd [#allocation4], 4294967168 }
  0x9c   :  { %94 = vsyncpa [#allocation3], 1 }
  0x9d   :  { %95 = vsyncpa [#allocation6], 1 }
  0x9e   :  { %96 = vsyncpa [#allocation4], 1 }

</bundles_post_ra>
